<compile_context>
chip_gen: v7x
topology: tpu7x:2x2x1
jax: 0.10.0
libtpu: 0.0.40
codegen_flags: <defaults>
</compile_context>

<pallas_src>
import functools

import jax
import jax.numpy as jnp
import numpy as np
from jax import lax
from jax.experimental import pallas as pl
from jax.experimental.pallas import tpu as pltpu


def _round_up(x, m):
    return ((x + m - 1) // m) * m


def _fused_conv_kernel(x_ref, pos_ref, w_ref, b_ref, o_ref, *,
                       ksize, stride, oh, owp, cin, kdimp):
    """One batch tile: pos-upsample + channel-concat + VALID strided conv.

    x_ref:   (H2, s, W2p, s*Cin)  bf16  split ("space-to-depth") view of x
    pos_ref: (HPp, WPp, 2)        bf16  low-res position map
    w_ref:   (COUTS, KDIMP)       bf16  regrouped im2col weight (see wrapper)
    b_ref:   (COUTS, 1)           f32   bias (sublane-padded)
    o_ref:   (COUTS, OH*OWp)      f32   transposed, NCHW-ordered output tile
    """
    xv = x_ref[...]
    pv = pos_ref[...]
    n_ah = (ksize - 1) // stride + 1
    n_aw = (ksize - 1) // stride + 1

    pieces = []
    # x taps: one full-width (s*Cin lanes) piece per (kh, kw//s) group; the
    # lane index l = bw*Cin + c maps to x[n, c, s*oh + kh, s*(ow + aw) + bw].
    for kh in range(ksize):
        ah, bh = kh // stride, kh % stride
        for aw in range(n_aw):
            pieces.append(xv[ah:ah + oh, bh, aw:aw + owp, :])
    # position taps: nearest upsample realized by slicing the low-res map.
    # All (kh, kw) sharing (kh//s, kw//s) read the same value, so their conv
    # weights were summed in the wrapper -> only one 2-lane piece per (ah, aw).
    for ah in range(n_ah):
        for aw in range(n_aw):
            pieces.append(pv[ah:ah + oh, aw:aw + owp, :])
    kused = sum(p.shape[-1] for p in pieces)
    if kused < kdimp:  # pad the contraction dim to a full 128-lane tile
        pieces.append(jnp.zeros((oh, owp, kdimp - kused), dtype=xv.dtype))

    # (OH, OWp, KDIMP) -> (OH*OWp, KDIMP): OWp is a multiple of 8, so merging
    # it into the sublane dim is layout-trivial.
    patch = jnp.concatenate(pieces, axis=-1).reshape(oh * owp, kdimp)

    # (COUTS, KDIMP) x (OH*OWp, KDIMP), contracting the shared 128-lane dim
    # (A @ B^T form, native MXU path), f32 accumulation.
    acc = lax.dot_general(w_ref[...], patch, (((1,), (1,)), ((), ())),
                          preferred_element_type=jnp.float32)
    o_ref[...] = (acc + b_ref[...]).astype(o_ref.dtype)


@functools.partial(jax.jit, static_argnames=("stride",))
def discriminator_output_block_with_position(input_tuple, weight_oihw, bias, *, stride):
    """Forward pass. input_tuple = (x, position), both NCHW (PyTorch convention)."""
    x, pos = input_tuple
    n, cin, h, w = x.shape
    _, pc, hp, wp = pos.shape
    cout, cin_tot, kh_, kw_ = weight_oihw.shape
    assert pc == 2 and cin_tot == cin + 2 and kh_ == kw_
    k, s = kh_, stride
    assert h % hp == 0 and w % wp == 0 and h % s == 0 and w % s == 0
    fh, fw = h // hp, w // wp
    # TODO(synk): a general fh/fw != stride config would need a materialized upsample path.
    assert fh == s and fw == s, "fused kernel assumes pos upsample factor == conv stride"

    oh = (h - k) // s + 1
    ow = (w - k) // s + 1
    owp = _round_up(ow, 8)              # sublane-aligned patch rows (pads OW only)
    couts = _round_up(cout, 8)          # output pads to 8 sublanes, NOT 128 lanes
    n_ah = (k - 1) // s + 1
    n_aw = (k - 1) // s + 1
    h2p = max(h // s, oh + n_ah - 1)
    w2p = max(w // s, owp + n_aw - 1)
    hpp = max(hp, oh + n_ah - 1)
    wpp = max(wp, owp + n_aw - 1)

    # ---- layout prep (bf16; cast+transpose+pad+reshape fuse under jit). The
    # NCHW API boundary forces one layout pass over x; a caller producing NHWC
    # (or the split layout) directly could skip it. ---------------------------
    x_nhwc = jnp.transpose(x.astype(jnp.bfloat16), (0, 2, 3, 1))
    x_nhwc = jnp.pad(x_nhwc, ((0, 0), (0, s * h2p - h), (0, s * w2p - w), (0, 0)))
    x5 = x_nhwc.reshape(n, h2p, s, w2p, s * cin)
    pos_nhwc = jnp.transpose(pos.astype(jnp.bfloat16), (0, 2, 3, 1))
    pos_nhwc = jnp.pad(pos_nhwc, ((0, 0), (0, hpp - hp), (0, wpp - wp), (0, 0)))

    # ---- weight regrouping to match the kernel's piece order ----------------
    wf = weight_oihw.astype(jnp.float32)
    wx = jnp.transpose(wf[:, :cin], (2, 3, 1, 0))       # (k, k, cin, cout)
    wpos = jnp.transpose(wf[:, cin:], (2, 3, 1, 0))     # (k, k, 2,   cout)
    rows = []
    for kh in range(k):
        for aw in range(n_aw):
            for bw in range(s):
                kw = s * aw + bw
                if kw < k:
                    rows.append(wx[kh, kw])                              # (cin, cout)
                else:  # lane exists in the s*Cin piece but tap is outside the kernel
                    rows.append(jnp.zeros((cin, cout), jnp.float32))
    for ah in range(n_ah):
        for aw in range(n_aw):
            # taps sharing (kh//s, kw//s) see the same upsampled position value:
            # fold their weights into a single (2, cout) row pair.
            rows.append(wpos[ah * s:min((ah + 1) * s, k),
                             aw * s:min((aw + 1) * s, k)].sum(axis=(0, 1)))
    w_rows = jnp.concatenate(rows, axis=0)               # (kdim_used, cout)
    kdim_used = w_rows.shape[0]
    kdimp = _round_up(kdim_used, 128)                    # lane-dense contraction dim
    w2 = jnp.zeros((kdimp, couts), jnp.float32).at[:kdim_used, :cout].set(w_rows)
    w2 = jnp.transpose(w2).astype(jnp.bfloat16)          # (couts, kdimp) bf16
    b2 = jnp.zeros((couts, 1), jnp.float32).at[:cout, 0].set(bias)

    mt = oh * owp
    flops = 2 * n * oh * ow * kdim_used * cout
    bytes_accessed = (2 * (x5.size + pos_nhwc.size + w2.size)
                      + 4 * (b2.size + n * couts * mt))

    kernel = functools.partial(_fused_conv_kernel, ksize=k, stride=s,
                               oh=oh, owp=owp, cin=cin, kdimp=kdimp)
    out3 = pl.pallas_call(
        kernel,
        grid=(n,),                                   # tiled over M (batch): pipelined
        in_specs=[
            pl.BlockSpec((None, h2p, s, w2p, s * cin), lambda i: (i, 0, 0, 0, 0)),
            pl.BlockSpec((None, hpp, wpp, 2), lambda i: (i, 0, 0, 0)),
            pl.BlockSpec((couts, kdimp), lambda i: (0, 0)),     # replicated weight
            pl.BlockSpec((couts, 1), lambda i: (0, 0)),         # replicated bias
        ],
        out_specs=pl.BlockSpec((None, couts, mt), lambda i: (i, 0, 0)),
        out_shape=jax.ShapeDtypeStruct((n, couts, mt), jnp.float32),
        compiler_params=pltpu.CompilerParams(
            dimension_semantics=("parallel",),       # megacore sharding on v7x
            vmem_limit_bytes=32 * 1024 * 1024),      # explicit; fits v7x 64 MiB VMEM
        cost_estimate=pl.CostEstimate(flops=flops, transcendentals=0,
                                      bytes_accessed=bytes_accessed),
    )(x5, pos_nhwc, w2, b2)

    # (N, COUTS, OH*OWp) is already NCHW-ordered: reshape + strip padding only.
    out = out3.reshape(n, couts, oh, owp)[:, :cout, :, :ow]
    return out.astype(x.dtype)


if __name__ == "__main__":
    # Module hyperparameters (small, consistent with the forward pass).
    in_channels = 4
    out_channels = 8
    kernel_size = 4
    stride = 2
    batch, height, width = 2, 16, 16

    key = jax.random.PRNGKey(0)
    kx, kp, kw, kb = jax.random.split(key, 4)

    # Inputs: x is NCHW; position is a 2-channel coordinate map on the stride grid.
    x = jax.random.normal(kx, (batch, in_channels, height, width), dtype=jnp.float32)
    pos = jax.random.uniform(
        kp, (batch, 2, height // stride, width // stride),
        dtype=jnp.float32, minval=-1.0, maxval=1.0)

    # Deterministic Conv2d parameters (PyTorch shape: (Cout, Cin+2, K, K)), fan-in scaled.
    cin_total = in_channels + 2
    fan_in = cin_total * kernel_size * kernel_size
    bound = 1.0 / np.sqrt(fan_in)
    weight = jax.random.uniform(
        kw, (out_channels, cin_total, kernel_size, kernel_size),
        dtype=jnp.float32, minval=-bound, maxval=bound)
    bias = jax.random.uniform(
        kb, (out_channels,), dtype=jnp.float32, minval=-bound, maxval=bound)

    out = discriminator_output_block_with_position((x, pos), weight, bias, stride=stride)
    out = jax.block_until_ready(out)

    # Plain-JAX f32 reference (nearest upsample + concat + VALID strided conv).
    pos_up = jnp.repeat(jnp.repeat(pos, height // pos.shape[2], axis=2),
                        width // pos.shape[3], axis=3)
    x_cat = jnp.concatenate([x, pos_up], axis=1)
    ref = lax.conv_general_dilated(
        jnp.transpose(x_cat, (0, 2, 3, 1)),
        jnp.transpose(weight, (2, 3, 1, 0)),
        window_strides=(stride, stride),
        padding="VALID",
        dimension_numbers=("NHWC", "HWIO", "NHWC"),
    ) + bias[None, None, None, :]
    ref = jnp.transpose(ref, (0, 3, 1, 2))

    # Kernel uses bf16 MXU inputs with f32 accumulation -> tolerance loosened vs f32 ref.
    np.testing.assert_allclose(np.asarray(out), np.asarray(ref), rtol=2e-2, atol=2e-2)
    assert out.shape == (batch, out_channels,
                         (height - kernel_size) // stride + 1,
                         (width - kernel_size) // stride + 1)
    print("KERNEL_OK")
</pallas_src>

<mosaic_0001>
module attributes {stable_mosaic.version = 11 : i64} {
  func.func @_fused_conv_kernel(%arg0: i32, %arg1: memref<1x8x2x9x8xbf16, #tpu.memory_space<vmem>>, %arg2: memref<1x8x9x2xbf16, #tpu.memory_space<vmem>>, %arg3: memref<8x128xbf16, #tpu.memory_space<vmem>>, %arg4: memref<8x1xf32, #tpu.memory_space<vmem>>, %arg5: memref<1x8x56xf32, #tpu.memory_space<vmem>>) attributes {dimension_semantics = [#tpu.dimension_semantics<parallel>], iteration_bounds = array<i64: 2>, scalar_prefetch = 0 : i64, scratch_operands = 0 : i64, tpu.core_type = #tpu.core_type<tc>, window_params = [{transform_indices = @transform_0, window_bounds = array<i64: 1, 8, 2, 9, 8>}, {transform_indices = @transform_1, window_bounds = array<i64: 1, 8, 9, 2>}, {pipeline_mode = #tpu.pipeline_mode<synchronous>, transform_indices = @transform_2, window_bounds = array<i64: 8, 128>}, {pipeline_mode = #tpu.pipeline_mode<synchronous>, transform_indices = @transform_3, window_bounds = array<i64: 8, 1>}, {transform_indices = @transform_4, window_bounds = array<i64: 1, 8, 56>}]} {
    %c0 = arith.constant 0 : index
    %c0_0 = arith.constant 0 : index
    %c0_1 = arith.constant 0 : index
    %c0_2 = arith.constant 0 : index
    %c0_3 = arith.constant 0 : index
    %0 = vector.load %arg1[%c0, %c0_0, %c0_1, %c0_2, %c0_3] : memref<1x8x2x9x8xbf16, #tpu.memory_space<vmem>>, vector<1x8x2x9x8xbf16>
    %1 = vector.shape_cast %0 : vector<1x8x2x9x8xbf16> to vector<8x2x9x8xbf16>
    %c0_4 = arith.constant 0 : index
    %c0_5 = arith.constant 0 : index
    %c0_6 = arith.constant 0 : index
    %c0_7 = arith.constant 0 : index
    %2 = vector.load %arg2[%c0_4, %c0_5, %c0_6, %c0_7] : memref<1x8x9x2xbf16, #tpu.memory_space<vmem>>, vector<1x8x9x2xbf16>
    %3 = vector.shape_cast %2 : vector<1x8x9x2xbf16> to vector<8x9x2xbf16>
    %4 = vector.extract_strided_slice %1 {offsets = [0, 0, 0, 0], sizes = [7, 1, 8, 8], strides = [1, 1, 1, 1]} : vector<8x2x9x8xbf16> to vector<7x1x8x8xbf16>
    %5 = vector.shape_cast %4 : vector<7x1x8x8xbf16> to vector<7x8x8xbf16>
    %6 = vector.extract_strided_slice %1 {offsets = [0, 0, 1, 0], sizes = [7, 1, 8, 8], strides = [1, 1, 1, 1]} : vector<8x2x9x8xbf16> to vector<7x1x8x8xbf16>
    %7 = vector.shape_cast %6 : vector<7x1x8x8xbf16> to vector<7x8x8xbf16>
    %8 = vector.extract_strided_slice %1 {offsets = [0, 1, 0, 0], sizes = [7, 1, 8, 8], strides = [1, 1, 1, 1]} : vector<8x2x9x8xbf16> to vector<7x1x8x8xbf16>
    %9 = vector.shape_cast %8 : vector<7x1x8x8xbf16> to vector<7x8x8xbf16>
    %10 = vector.extract_strided_slice %1 {offsets = [0, 1, 1, 0], sizes = [7, 1, 8, 8], strides = [1, 1, 1, 1]} : vector<8x2x9x8xbf16> to vector<7x1x8x8xbf16>
    %11 = vector.shape_cast %10 : vector<7x1x8x8xbf16> to vector<7x8x8xbf16>
    %12 = vector.extract_strided_slice %1 {offsets = [1, 0, 0, 0], sizes = [7, 1, 8, 8], strides = [1, 1, 1, 1]} : vector<8x2x9x8xbf16> to vector<7x1x8x8xbf16>
    %13 = vector.shape_cast %12 : vector<7x1x8x8xbf16> to vector<7x8x8xbf16>
    %14 = vector.extract_strided_slice %1 {offsets = [1, 0, 1, 0], sizes = [7, 1, 8, 8], strides = [1, 1, 1, 1]} : vector<8x2x9x8xbf16> to vector<7x1x8x8xbf16>
    %15 = vector.shape_cast %14 : vector<7x1x8x8xbf16> to vector<7x8x8xbf16>
    %16 = vector.extract_strided_slice %1 {offsets = [1, 1, 0, 0], sizes = [7, 1, 8, 8], strides = [1, 1, 1, 1]} : vector<8x2x9x8xbf16> to vector<7x1x8x8xbf16>
    %17 = vector.shape_cast %16 : vector<7x1x8x8xbf16> to vector<7x8x8xbf16>
    %18 = vector.extract_strided_slice %1 {offsets = [1, 1, 1, 0], sizes = [7, 1, 8, 8], strides = [1, 1, 1, 1]} : vector<8x2x9x8xbf16> to vector<7x1x8x8xbf16>
    %19 = vector.shape_cast %18 : vector<7x1x8x8xbf16> to vector<7x8x8xbf16>
    %20 = vector.extract_strided_slice %3 {offsets = [0, 0, 0], sizes = [7, 8, 2], strides = [1, 1, 1]} : vector<8x9x2xbf16> to vector<7x8x2xbf16>
    %21 = vector.extract_strided_slice %3 {offsets = [0, 1, 0], sizes = [7, 8, 2], strides = [1, 1, 1]} : vector<8x9x2xbf16> to vector<7x8x2xbf16>
    %22 = vector.extract_strided_slice %3 {offsets = [1, 0, 0], sizes = [7, 8, 2], strides = [1, 1, 1]} : vector<8x9x2xbf16> to vector<7x8x2xbf16>
    %23 = vector.extract_strided_slice %3 {offsets = [1, 1, 0], sizes = [7, 8, 2], strides = [1, 1, 1]} : vector<8x9x2xbf16> to vector<7x8x2xbf16>
    %cst = arith.constant 0.000000e+00 : bf16
    %24 = vector.broadcast %cst : bf16 to vector<7x8x56xbf16>
    %25 = tpu.concatenate %5, %7, %9, %11, %13, %15, %17, %19, %20, %21, %22, %23, %24 in 2 : vector<7x8x8xbf16>, vector<7x8x8xbf16>, vector<7x8x8xbf16>, vector<7x8x8xbf16>, vector<7x8x8xbf16>, vector<7x8x8xbf16>, vector<7x8x8xbf16>, vector<7x8x8xbf16>, vector<7x8x2xbf16>, vector<7x8x2xbf16>, vector<7x8x2xbf16>, vector<7x8x2xbf16>, vector<7x8x56xbf16> -> vector<7x8x128xbf16>
    %26 = vector.shape_cast %25 : vector<7x8x128xbf16> to vector<56x128xbf16>
    %c0_8 = arith.constant 0 : index
    %c0_9 = arith.constant 0 : index
    %27 = vector.load %arg3[%c0_8, %c0_9] : memref<8x128xbf16, #tpu.memory_space<vmem>>, vector<8x128xbf16>
    %cst_10 = arith.constant dense<0.000000e+00> : vector<8x56xf32>
    %28 = tpu.matmul %27, %26, %cst_10 {dimension_numbers = #tpu.dot_dimension_numbers<[1], [1], [0], [0], [0, 0, 1, 0], [], []>} : vector<8x128xbf16>, vector<56x128xbf16>, vector<8x56xf32> -> vector<8x56xf32>
    %c0_11 = arith.constant 0 : index
    %c0_12 = arith.constant 0 : index
    %29 = vector.load %arg4[%c0_11, %c0_12] : memref<8x1xf32, #tpu.memory_space<vmem>>, vector<8x1xf32>
    %30 = vector.broadcast %29 : vector<8x1xf32> to vector<8x56xf32>
    %31 = arith.addf %28, %30 : vector<8x56xf32>
    %c0_13 = arith.constant 0 : index
    %c0_14 = arith.constant 0 : index
    %c0_15 = arith.constant 0 : index
    %32 = vector.load %arg5[%c0_13, %c0_14, %c0_15] : memref<1x8x56xf32, #tpu.memory_space<vmem>>, vector<1x8x56xf32>
    %33 = vector.shape_cast %32 : vector<1x8x56xf32> to vector<8x56xf32>
    %34 = vector.shape_cast %31 : vector<8x56xf32> to vector<1x8x56xf32>
    tpu.vector_store %arg5[%c0_13, %c0_14, %c0_15], %34 {strides = array<i32>} : memref<1x8x56xf32, #tpu.memory_space<vmem>>, vector<1x8x56xf32>,
    return
  }
  func.func @transform_0(%arg0: i32) -> (i32, i32, i32, i32, i32) {
    %c0_i32 = arith.constant 0 : i32
    %c0_i32_0 = arith.constant 0 : i32
    %c0_i32_1 = arith.constant 0 : i32
    %c0_i32_2 = arith.constant 0 : i32
    %c0_i32_3 = arith.constant 0 : i32
    return %arg0, %c0_i32, %c0_i32_0, %c0_i32_1, %c0_i32_2 : i32, i32, i32, i32, i32
  }
  func.func @transform_1(%arg0: i32) -> (i32, i32, i32, i32) {
    %c0_i32 = arith.constant 0 : i32
    %c0_i32_0 = arith.constant 0 : i32
    %c0_i32_1 = arith.constant 0 : i32
    %c0_i32_2 = arith.constant 0 : i32
    return %arg0, %c0_i32, %c0_i32_0, %c0_i32_1 : i32, i32, i32, i32
  }
  func.func @transform_2(%arg0: i32) -> (i32, i32) {
    %c0_i32 = arith.constant 0 : i32
    %c0_i32_0 = arith.constant 0 : i32
    %c0_i32_1 = arith.constant 0 : i32
    return %c0_i32, %c0_i32_0 : i32, i32
  }
  func.func @transform_3(%arg0: i32) -> (i32, i32) {
    %c0_i32 = arith.constant 0 : i32
    %c0_i32_0 = arith.constant 0 : i32
    %c0_i32_1 = arith.constant 0 : i32
    return %c0_i32, %c0_i32_0 : i32, i32
  }
  func.func @transform_4(%arg0: i32) -> (i32, i32, i32) {
    %c0_i32 = arith.constant 0 : i32
    %c0_i32_0 = arith.constant 0 : i32
    %c0_i32_1 = arith.constant 0 : i32
    return %arg0, %c0_i32, %c0_i32_0 : i32, i32, i32
  }
}

</mosaic_0001>

<bundles_post_ra>
// kernel: discriminator_output_block_with_position.1
= control target key start
LH: loop header
LB: loop body
LE: loop exit
PB: predicated region body
PF: predicated region fallthrough
CT: control target
= control target key end

     0   :  { %s1246_s15 = smov 0   ;;  %s1579_s0 = inlined_call_operand.vmem [shape: bf16[2,8,2,9,8], index: 0, kind: input, shape index: {}]   ;;  %s1580_s1 = inlined_call_operand.vmem [shape: bf16[2,8,9,2], index: 1, kind: input, shape index: {}]   ;;  %s1581_s2 = inlined_call_operand.vmem [shape: bf16[8,128], index: 2, kind: input, shape index: {}]   ;;  %s1582_s3 = inlined_call_operand.vmem [shape: f32[8,1], index: 3, kind: input, shape index: {}]   ;;  %s1583_s4 = inlined_call_operand.vmem [shape: f32[2,8,56], index: 4, kind: output, shape index: {}]  }
   0x1 LB: > { %s1046_s16 = sadd.s32 4294967295, %s1205_s15   ;;  %p1050_p0 = scmp.ge.s32.totalorder %s1205_s15, 1  ;;  %s1205_s15 = sphi %s1246_s15, %s14_s15  }
   0x2   : > { %p172_p1 = scmp.lt.s32.totalorder %s1205_s15, 3 }
   0x4   : > { %p173_p2 = pnand %p1050_p0, %p172_p1 }
   0x5   : > { %p202_p3 = scmp.lt.s32.totalorder (!%p173_p2), %s1046_s16, 1  ;;  %s1207_s21 = smov (!%p173_p2), 16   ;;  %vm1219_vm0 = vmmov (!%p173_p2), 0   ;;  %vm730_vm1 = vcmask (!%p173_p2), 64512   ;;  %vm752_vm2 = vcmask (!%p173_p2), 130048   ;;  %vm767_vm3 = vcmask (!%p173_p2), 195584  }
   0x6   : > { %176 = sbr.rel (%p173_p2) target bundleno = 516 (0x204), region = 36  ;;  %s1208_s22 = smov (!%p173_p2), 32   ;;  %vm782_vm4 = vcmask (!%p173_p2), 261120   ;;  %vm797_vm5 = vcmask (!%p173_p2), 326656   ;;  %vm812_vm6 = vcmask (!%p173_p2), 392192   ;;  %vm827_vm7 = vcmask (!%p173_p2), 457728  }
   0x7   : > { %s1209_s23 = smov (!%p173_p2), 8   ;;  %s1210_s24 = smov (!%p173_p2), 24   ;;  %vm842_vm8 = vcmask (!%p173_p2), 523264   ;;  %vm857_vm9 = vcmask (!%p173_p2), 539648   ;;  %vm872_vm10 = vcmask (!%p173_p2), 556032   ;;  %vm887_vm11 = vcmask (!%p173_p2), 572416  }
   0x8   : > { %s1211_s26 = smov (!%p173_p2), 40   ;;  %s1212_s30 = smov (!%p173_p2), 48   ;;  %vm902_vm12 = vcmask (!%p173_p2), 588800  }
   0x9   : > { %s1213_s5 = smov (!%p173_p2), 56   ;;  %s1214_s6 = smov (!%p173_p2), 64  }
   0xa   : > { %s1215_s7 = smov (!%p173_p2), 66   ;;  %s1216_s8 = smov (!%p173_p2), 68  }
   0xb   : > { %s1218_s9 = smov (!%p173_p2), 70  }
   0xd   : > { %s1585_s16 = smov (!%p202_p3, %s1046_s16), 1 }
   0xe   : > { %s1109_s17 = sshll.u32 %s1585_s16, 7  ;;  %s1110_s25 = sshll.u32 %s1585_s16, 6 }
   0xf   : > { %s1260_s20 = scalar_lea.vmem %s1579_s0, %s1109_s17  ;;  %s1304_s29 = scalar_lea.vmem %s1580_s1, %s1110_s25 }
  0x10   : > { %v219_v0 = vld [vmem:[%s1260_s20 + $0x8] sm:$0xf]  ;;  %v220_v1 = vld [vmem:[%s1260_s20 + $0xc] sm:$0x1]  ;;  %v1265_v2 = vld [vmem:[%s1260_s20 + $0x10] sm:$0xf] }
  0x11   : > { %v1063_v3 = vcombine.low %v219_v0, %v219_v0  ;;  %v222_v4 = vld [vmem:[%s1260_s20 + $0x14] sm:$0x1]  ;;  %v1077_v5 = vcombine.low %v1265_v2, %v1265_v2  ;;  %v223_v6 = vld [vmem:[%s1260_s20 + $0x18] sm:$0xf]  ;;  %v224_v7 = vld [vmem:[%s1260_s20 + $0x1c] sm:$0x1]  ;;  %v1070_v8 = vcombine.low %v219_v0, %v220_v1 }
  0x12   : > { %v1057_v9 = vcombine.low %v1265_v2, %v222_v4  ;;  %v1071_v10 = vcombine.low %v223_v6, %v224_v7  ;;  %v1274_v11 = vld [vmem:[%s1260_s20] sm:$0xf]  ;;  %v218_v12 = vld [vmem:[%s1260_s20 + $0x4] sm:$0x1]  ;;  %v1064_v13 = vcombine.low %v223_v6, %v223_v6  ;;  %v227_v26 = vld [vmem:[%s1260_s20 + $0x28] sm:$0xf] }
  0x13   : > { %384 = vrot.lane.b32.xlu1 %v1063_v3, %s1207_s21  ;;  %491 = vrot.lane.b32.xlu0 %v1077_v5, %s1208_s22  ;;  %v1056_v14 = vcombine.low %v1274_v11, %v218_v12  ;;  %v1281_v15 = vld [vmem:[%s1260_s20 + $0x20] sm:$0xf]  ;;  %v226_v16 = vld [vmem:[%s1260_s20 + $0x24] sm:$0x1]  ;;  %v422_v22 = vshll.u32 %v1070_v8, 16  ;;  %v420_v33 = vshrl.u32 %v1070_v8, 16  ;;  %v1065_v45 = vcombine.low %v227_v26, %v227_v26 }
  0x14   : > { %v310_v17 = vshll.u32 %v1057_v9, 16  ;;  %v429_v18 = vshll.u32 %v1071_v10, 16  ;;  %v1058_v21 = vcombine.low %v1281_v15, %v226_v16  ;;  %v1078_v23 = vcombine.low %v1281_v15, %v1281_v15  ;;  %v228_v31 = vld [vmem:[%s1260_s20 + $0x2c] sm:$0x1]  ;;  %v1296_v43 = vld [vmem:[%s1260_s20 + $0x30] sm:$0xf] }
  0x15   : > { %v301_v19 = vshrl.u32 %v1056_v14, 16  ;;  %v303_v20 = vshll.u32 %v1056_v14, 16  ;;  %v308_v24 = vshrl.u32 %v1057_v9, 16  ;;  %v427_v25 = vshrl.u32 %v1071_v10, 16  ;;  %v230_v44 = vld [vmem:[%s1260_s20 + $0x34] sm:$0x1] }
  0x16   : > { %v312_v28 = vrot.slane %v310_v17, 1  ;;  %v431_v29 = vrot.slane %v429_v18, 1  ;;  %v317_v30 = vshll.u32 %v1058_v21, 16  ;;  %v424_v34 = vrot.slane %v422_v22, 1  ;;  %v252_v49 = vld [vmem:[%s1304_s29 + $0xc] sm:$0x1] }
  0x17   : > { %386 = vrot.lane.b32.xlu1 %v1064_v13, %s1207_s21  ;;  %v305_v27 = vrot.slane %v303_v20, 1  ;;  %v1072_v35 = vcombine.low %v227_v26, %v228_v31  ;;  %v315_v38 = vshrl.u32 %v1058_v21, 16  ;;  %v1059_v48 = vcombine.low %v1296_v43, %v230_v44  ;;  %v251_v50 = vld [vmem:[%s1304_s29 + $0x8] sm:$0xf]  ;;  %v250_v54 = vld [vmem:[%s1304_s29 + $0x4] sm:$0x1] }
  0x18   : > { %v313_v36 = vor.u32 %v312_v28, %v308_v24  ;;  %v432_v37 = vor.u32 %v431_v29, %v427_v25  ;;  %v319_v39 = vrot.slane %v317_v30, 1  ;;  %v425_v40 = vor.u32 %v424_v34, %v420_v33  ;;  %v249_v56 = vld [vmem:[%s1304_s29] sm:$0xf]  ;;  %v232_v3 = vld [vmem:[%s1260_s20 + $0x3c] sm:$0x1]  ;;  %s1055_s14 = sshll.u32 %s1585_s16, 3 }
  0x19   : > { %v306_v32 = vor.u32 %v305_v27, %v301_v19  ;;  %v436_v42 = vshll.u32 %v1072_v35, 16  ;;  %v434_v46 = vshrl.u32 %v1072_v35, 16  ;;  %v1095_v52 = vcombine.low %v251_v50, %v252_v49  ;;  %v231_v4 = vld [vmem:[%s1260_s20 + $0x38] sm:$0xf]  ;;  %v254_v9 = vld [vmem:[%s1304_s29 + $0x14] sm:$0x1]  ;;  %s215_s19 = scalar_lea.vmem %s1583_s4, %s1055_s14 }
  0x1a   : > { %v320_v41 = vor.u32 %v319_v39, %v315_v38  ;;  %v324_v53 = vshll.u32 %v1059_v48, 16  ;;  %v1088_v55 = vcombine.low %v251_v50, %v251_v50  ;;  %v1094_v57 = vcombine.low %v249_v56, %v250_v54  ;;  %v253_v10 = vld [vmem:[%s1304_s29 + $0x10] sm:$0xf]  ;;  %v1331_v21 = vld [vmem:[%s1260_s20 + $0x40] sm:$0xf] }
  0x1b   : > { %349 = vrot.lane.b32.xlu0 %v306_v32, %s1209_s23  ;;  %493 = vrot.lane.b32.xlu1 %v1078_v23, %s1208_s22  ;;  %v438_v47 = vrot.slane %v436_v42, 1  ;;  %v322_v58 = vshrl.u32 %v1059_v48, 16  ;;  %v636_v60 = vshll.u32 %v1095_v52, 16  ;;  %v1087_v61 = vcombine.low %v249_v56, %v249_v56  ;;  %v234_v22 = vld [vmem:[%s1260_s20 + $0x44] sm:$0x1] }
  0x1c   : > { %v326_v59 = vrot.slane %v324_v53, 1  ;;  %v634_v63 = vshrl.u32 %v1095_v52, 16  ;;  %v629_v1 = vshll.u32 %v1094_v57, 16  ;;  %v627_v6 = vshrl.u32 %v1094_v57, 16  ;;  %v235_v30 = vld [vmem:[%s1260_s20 + $0x48] sm:$0xf] }
  0x1d   : > { %v439_v51 = vor.u32 %v438_v47, %v434_v46  ;;  %v638_v0 = vrot.slane %v636_v60, 1  ;;  %v1073_v8 = vcombine.low %v231_v4, %v232_v3  ;;  %v1096_v14 = vcombine.low %v253_v10, %v254_v9  ;;  %v236_v31 = vld [vmem:[%s1260_s20 + $0x4c] sm:$0x1]  ;;  %v1351_v39 = vld [vmem:[%s1260_s20 + $0x50] sm:$0xf] }
  0x1e   : > { %v1317_v62 = vor.u32 %v326_v59, %v322_v58  ;;  %v631_v7 = vrot.slane %v629_v1, 1  ;;  %v1089_v17 = vcombine.low %v253_v10, %v253_v10  ;;  %v1060_v26 = vcombine.low %v1331_v21, %v234_v22  ;;  %v256_v46 = vld [vmem:[%s1304_s29 + $0x1c] sm:$0x1]  ;;  %v255_v47 = vld [vmem:[%s1304_s29 + $0x18] sm:$0xf] }
  0x1f   : > { %351 = vrot.lane.b32.xlu0 %v313_v36, %s1209_s23  ;;  %470 = vrot.lane.b32.xlu1 %v432_v37, %s1210_s24  ;;  %v639_v5 = vor.u32 %v638_v0, %v634_v63  ;;  %v443_v16 = vshll.u32 %v1073_v8, 16  ;;  %v441_v18 = vshrl.u32 %v1073_v8, 16  ;;  %v643_v20 = vshll.u32 %v1096_v14, 16  ;;  %v240_v58 = vld [vmem:[%s1260_s20 + $0x5c] sm:$0x1] }
  0x20   : > { %v632_v12 = vor.u32 %v631_v7, %v627_v6  ;;  %v641_v24 = vshrl.u32 %v1096_v14, 16  ;;  %v1217_v27 = vmov 0.0   ;;  %v331_v29 = vshll.u32 %v1060_v26, 16  ;;  %v239_v59 = vld [vmem:[%s1260_s20 + $0x58] sm:$0xf] }
  0x21   : > { %v445_v19 = vrot.slane %v443_v16, 1  ;;  %v645_v25 = vrot.slane %v643_v20, 1  ;;  %1116 = vmatprep.subr.bf16.mxu0 %v1217_v27  ;;  %v1080_v32 = vcombine.low %v1331_v21, %v1331_v21  ;;  %v329_v33 = vshrl.u32 %v1060_v26, 16  ;;  %v257_v63 = vld [vmem:[%s1304_s29 + $0x20] sm:$0xf]  ;;  %1124 = vmatprep.mubr.msk.bf16.mxu0 %vm1219_vm0, %v1217_v27 }
  0x22   : > { %v333_v34 = vrot.slane %v331_v29, 1  ;;  %v1074_v35 = vcombine.low %v235_v30, %v236_v31  ;;  %v1097_v49 = vcombine.low %v255_v47, %v256_v46  ;;  %v1068_v0 = vcombine.low %v239_v59, %v239_v59  ;;  %v1377_v8 = vld [vmem:[%s1260_s20 + $0x60] sm:$0xf]  ;;  %v242_v9 = vld [vmem:[%s1260_s20 + $0x64] sm:$0x1] }
  0x23   : > { %468 = vrot.lane.b32.xlu0 %v425_v40, %s1210_s24  ;;  %517 = vrot.lane.b32.xlu1 %v320_v41, %s1211_s26  ;;  %v446_v23 = vor.u32 %v445_v19, %v441_v18  ;;  %v646_v28 = vor.u32 %v645_v25, %v641_v24  ;;  %v238_v40 = vld [vmem:[%s1260_s20 + $0x54] sm:$0x1]  ;;  %v1062_v14 = vcombine.low %v1377_v8, %v242_v9  ;;  %v243_v18 = vld [vmem:[%s1260_s20 + $0x68] sm:$0xf] }
  0x24   : > { %v450_v38 = vshll.u32 %v1074_v35, 16  ;;  %v448_v42 = vshrl.u32 %v1074_v35, 16  ;;  %v650_v54 = vshll.u32 %v1097_v49, 16  ;;  %v648_v56 = vshrl.u32 %v1097_v49, 16  ;;  %v244_v19 = vld [vmem:[%s1260_s20 + $0x6c] sm:$0x1] }
  0x25   : > { %v1082_v20 = vcombine.low %v1377_v8, %v1377_v8  ;;  %v343_v22 = vshrl.u32 %v1062_v14, 16  ;;  %v1076_v24 = vcombine.low %v243_v18, %v244_v19  ;;  %v1081_v25 = vcombine.low %v1351_v39, %v1351_v39  ;;  %v262_v46 = vld [vmem:[%s1304_s29 + $0x34] sm:$0x1] }
  0x26   : > { %v452_v44 = vrot.slane %v450_v38, 1  ;;  %v652_v57 = vrot.slane %v650_v54, 1  ;;  %v1069_v29 = vcombine.low %v243_v18, %v243_v18 }
  0x27   : > { %515 = vrot.lane.b32.xlu0 %v313_v36, %s1211_s26  ;;  %534 = vrot.lane.b32.xlu1 %v1065_v45, %s1212_s30  ;;  %v1079_v36 = vcombine.low %v1296_v43, %v1296_v43 }
  0x28   : > { %v453_v48 = vor.u32 %v452_v44, %v448_v42  ;;  %v653_v60 = vor.u32 %v652_v57, %v648_v56 }
  0x2b   : > { %532 = vrot.lane.b32.xlu0 %v1064_v13, %s1212_s30  ;;  %558 = vrot.lane.b32.xlu1 %v439_v51, %s1213_s5  ;;  %v1066_v13 = vcombine.low %v231_v4, %v231_v4  ;;  %v1091_v4 = vcombine.low %v257_v63, %v257_v63 }
  0x2f   : > { %556 = vrot.lane.b32.xlu0 %v432_v37, %s1213_s5  ;;  %593 = vrot.lane.b32.xlu1 %v1088_v55, %s1214_s6  ;;  %v334_v37 = vor.u32 %v333_v34, %v329_v33  ;;  %v259_v33 = vld [vmem:[%s1304_s29 + $0x28] sm:$0xf]  ;;  %v260_v34 = vld [vmem:[%s1304_s29 + $0x2c] sm:$0x1] }
  0x30   : > { %v1092_v35 = vcombine.low %v259_v33, %v259_v33 }
  0x33   : > { %591 = vrot.lane.b32.xlu0 %v1087_v61, %s1214_s6  ;;  %355 = vrot.lane.b32.xlu1 %v1317_v62, %s1209_s23  ;;  %v1075_v61 = vcombine.low %v239_v59, %v240_v58  ;;  %v247_v58 = vld [vmem:[%s1260_s20 + $0x78] sm:$0xf]  ;;  %v248_v59 = vld [vmem:[%s1260_s20 + $0x7c] sm:$0x1] }
  0x35   : > { %v457_v3 = vshll.u32 %v1075_v61, 16 }
  0x37   : > { %353 = vrot.lane.b32.xlu0 %v320_v41, %s1209_s23  ;;  %677 = vrot.lane.b32.xlu1 %v639_v5, %s1215_s7  ;;  %v1067_v41 = vcombine.low %v235_v30, %v235_v30  ;;  %v459_v6 = vrot.slane %v457_v3, 1  ;;  %v462_v30 = vshrl.u32 %v1076_v24, 16  ;;  %v1086_v3 = vcombine.low %v247_v58, %v248_v59 }
  0x39   : > { %v550_v19 = vshrl.u32 %v1086_v3, 16 }
  0x3b   : > { %675 = vrot.lane.b32.xlu0 %v632_v12, %s1215_s7  ;;  %390 = vrot.lane.b32.xlu1 %v1066_v13, %s1207_s21 }
  0x3f   : > { %388 = vrot.lane.b32.xlu0 %v1065_v45, %s1207_s21  ;;  %694 = vrot.lane.b32.xlu1 %v1089_v17, %s1216_s8  ;;  %v1061_v45 = vcombine.low %v1351_v39, %v238_v40 }
  0x41   : > { %v338_v50 = vshll.u32 %v1061_v45, 16  ;;  %v336_v52 = vshrl.u32 %v1061_v45, 16  ;;  %v261_v45 = vld [vmem:[%s1304_s29 + $0x30] sm:$0xf] }
  0x43   : > { %692 = vrot.lane.b32.xlu0 %v1088_v55, %s1216_s8  ;;  %474 = vrot.lane.b32.xlu1 %v446_v23, %s1210_s24  ;;  %v340_v53 = vrot.slane %v338_v50, 1  ;;  %v1093_v50 = vcombine.low %v261_v45, %v261_v45 }
  0x45   : > { %v341_v55 = vor.u32 %v340_v53, %v336_v52  ;;  %v245_v52 = vld [vmem:[%s1260_s20 + $0x70] sm:$0xf]  ;;  %v246_v53 = vld [vmem:[%s1260_s20 + $0x74] sm:$0x1] }
  0x46   : > { %v1084_v56 = vcombine.low %v245_v52, %v246_v53 }
  0x47   : > { %472 = vrot.lane.b32.xlu0 %v439_v51, %s1210_s24  ;;  %718 = vrot.lane.b32.xlu1 %v646_v28, %s1218_s9  ;;  %v1090_v51 = vcombine.low %v255_v47, %v255_v47 }
  0x4b   : > { %716 = vrot.lane.b32.xlu0 %v639_v5, %s1218_s9  ;;  %497 = vrot.lane.b32.xlu1 %v1080_v32, %s1208_s22  ;;  %v455_v5 = vshrl.u32 %v1075_v61, 16 }
  0x4d   : > { %v460_v10 = vor.u32 %v459_v6, %v455_v5  ;;  %v509_v6 = vshrl.u32 %v1084_v56, 16 }
  0x4f   : > { %495 = vrot.lane.b32.xlu0 %v1079_v36, %s1208_s22  ;;  %521 = vrot.lane.b32.xlu1 %v334_v37, %s1211_s26  ;;  %v1099_v36 = vcombine.low %v259_v33, %v260_v34 }
  0x51   : > { %v664_v40 = vshll.u32 %v1099_v36, 16  ;;  %v662_v42 = vshrl.u32 %v1099_v36, 16 }
  0x53   : > { %519 = vrot.lane.b32.xlu0 %v1317_v62, %s1211_s26  ;;  %538 = vrot.lane.b32.xlu1 %v1067_v41, %s1212_s30  ;;  %v258_v62 = vld [vmem:[%s1304_s29 + $0x24] sm:$0x1]  ;;  %v666_v44 = vrot.slane %v664_v40, 1 }
  0x54   : > { %v1098_v1 = vcombine.low %v257_v63, %v258_v62  ;;  %v1083_v62 = vcombine.low %v245_v52, %v245_v52 }
  0x55   : > { %v667_v49 = vor.u32 %v666_v44, %v662_v42  ;;  %v912_v44 = vld [vmem:[%s1582_s3] sm:$0xff] }
  0x56   : > { %v657_v7 = vshll.u32 %v1098_v1, 16  ;;  %v655_v12 = vshrl.u32 %v1098_v1, 16  ;;  %v511_v1 = vshll.u32 %v1084_v56, 16 }
  0x57   : > { %536 = vrot.lane.b32.xlu0 %v1066_v13, %s1212_s30  ;;  %562 = vrot.lane.b32.xlu1 %v453_v48, %s1213_s5 }
  0x58   : > { %v659_v13 = vrot.slane %v657_v7, 1  ;;  %v513_v9 = vrot.slane %v511_v1, 1 }
  0x5a   : > { %v660_v16 = vor.u32 %v659_v13, %v655_v12  ;;  %v552_v12 = vshll.u32 %v1086_v3, 16  ;;  %v263_v13 = vld [vmem:[%s1304_s29 + $0x38] sm:$0xf]  ;;  %v514_v18 = vor.u32 %v513_v9, %v509_v6 }
  0x5b   : > { %560 = vrot.lane.b32.xlu0 %v446_v23, %s1213_s5  ;;  %597 = vrot.lane.b32.xlu1 %v1090_v51, %s1214_s6 }
  0x5f   : > { %595 = vrot.lane.b32.xlu0 %v1089_v17, %s1214_s6  ;;  %359 = vrot.lane.b32.xlu1 %v341_v55, %s1209_s23  ;;  %v345_v17 = vshll.u32 %v1062_v14, 16  ;;  %v264_v14 = vld [vmem:[%s1304_s29 + $0x3c] sm:$0x1] }
  0x61   : > { %v347_v23 = vrot.slane %v345_v17, 1 }
  0x63   : > { %357 = vrot.lane.b32.xlu0 %v334_v37, %s1209_s23  ;;  %681 = vrot.lane.b32.xlu1 %v653_v60, %s1215_s7  ;;  %v348_v26 = vor.u32 %v347_v23, %v343_v22  ;;  %v1102_v22 = vcombine.low %v263_v13, %v264_v14 }
  0x67   : > { %679 = vrot.lane.b32.xlu0 %v646_v28, %s1215_s7  ;;  %394 = vrot.lane.b32.xlu1 %v1068_v0, %s1207_s21  ;;  %v464_v28 = vshll.u32 %v1076_v24, 16 }
  0x69   : > { %v466_v31 = vrot.slane %v464_v28, 1  ;;  %v712_v28 = vshll.u32 %v1102_v22, 16 }
  0x6b   : > { %392 = vrot.lane.b32.xlu0 %v1067_v41, %s1207_s21  ;;  %698 = vrot.lane.b32.xlu1 %v1091_v4, %s1216_s8  ;;  %v467_v32 = vor.u32 %v466_v31, %v462_v30  ;;  %v710_v31 = vshrl.u32 %v1102_v22, 16 }
  0x6f   : > { %696 = vrot.lane.b32.xlu0 %v1090_v51, %s1216_s8  ;;  %478 = vrot.lane.b32.xlu1 %v460_v10, %s1210_s24  ;;  %v1100_v51 = vcombine.low %v261_v45, %v262_v46  ;;  %v1220_v45 = vmov 0  }
  0x70   : > { %1150 = vset.pattern.permute.xlu1 %v1220_v45  ;;  %1151 = vset.pattern.permute.xlu0 %v1220_v45 }
  0x71   : > { %v671_v57 = vshll.u32 %v1100_v51, 16  ;;  %v669_v63 = vshrl.u32 %v1100_v51, 16 }
  0x73   : > { %476 = vrot.lane.b32.xlu0 %v453_v48, %s1210_s24  ;;  %722 = vrot.lane.b32.xlu1 %v660_v16, %s1218_s9 }
  0x77   : > { %720 = vrot.lane.b32.xlu0 %v653_v60, %s1218_s9  ;;  %501 = vrot.lane.b32.xlu1 %v1082_v20, %s1208_s22  ;;  %v554_v20 = vrot.slane %v552_v12, 1 }
  0x7b   : > { %499 = vrot.lane.b32.xlu0 %v1081_v25, %s1208_s22  ;;  %525 = vrot.lane.b32.xlu1 %v348_v26, %s1211_s26  ;;  %v555_v25 = vor.u32 %v554_v20, %v550_v19 }
  0x7f   : > { %523 = vrot.lane.b32.xlu0 %v341_v55, %s1211_s26  ;;  %542 = vrot.lane.b32.xlu1 %v1069_v29, %s1212_s30 }
  0x83   : > { %540 = vrot.lane.b32.xlu0 %v1068_v0, %s1212_s30  ;;  %566 = vrot.lane.b32.xlu1 %v467_v32, %s1213_s5  ;;  %v673_v0 = vrot.slane %v671_v57, 1 }
  0x85   : > { %v1403_v37 = vpop.permute.xlu1 %384  ;;  %v1406_v38 = vpop.permute.xlu0 %491  ;;  %v674_v7 = vor.u32 %v673_v0, %v669_v63 }
  0x87   : > { %564 = vrot.lane.b32.xlu0 %v460_v10, %s1213_s5  ;;  %601 = vrot.lane.b32.xlu1 %v1092_v35, %s1214_s6  ;;  %v1085_v10 = vcombine.low %v247_v58, %v247_v58 }
  0x89   : > { %v1409_v41 = vpop.permute.xlu1 %386 }
  0x8b   : > { %599 = vrot.lane.b32.xlu0 %v1091_v4, %s1214_s6  ;;  %683 = vrot.lane.b32.xlu1 %v660_v16, %s1215_s7 }
  0x8d   : > { %v1415_v47 = vpop.permute.xlu0 %349  ;;  %v1417_v48 = vpop.permute.xlu1 %493 }
  0x8f   : > { %361 = vrot.lane.b32.xlu0 %v348_v26, %s1209_s23  ;;  %396 = vrot.lane.b32.xlu1 %v1069_v29, %s1207_s21  ;;  %v1101_v26 = vcombine.low %v263_v13, %v263_v13 }
  0x91   : > { %v352_v54 = vpop.permute.xlu0 %351  ;;  %v1423_v55 = vpop.permute.xlu1 %470 }
  0x92   : > { %v736_v36 = vsel %vm730_vm1, %v1265_v2, %v352_v54  ;;  %v733_v2 = vsel %vm730_vm1, %v1274_v11, %v1415_v47 }
  0x93   : > { %685 = vrot.lane.b32.xlu0 %v667_v49, %s1215_s7  ;;  %702 = vrot.lane.b32.xlu1 %v1093_v50, %s1216_s8  ;;  %v756_v46 = vsel %vm752_vm2, %v736_v36, %v1409_v41  ;;  %v754_v52 = vsel %vm752_vm2, %v733_v2, %v1403_v37 }
  0x94   : > { %v771_v51 = vsel %vm767_vm3, %v756_v46, %v1423_v55 }
  0x95   : > { %v1429_v60 = vpop.permute.xlu0 %468  ;;  %v1431_v61 = vpop.permute.xlu1 %517  ;;  %v786_v53 = vsel %vm782_vm4, %v771_v51, %v1417_v48 }
  0x96   : > { %v769_v41 = vsel %vm767_vm3, %v754_v52, %v1429_v60  ;;  %v801_v47 = vsel %vm797_vm5, %v786_v53, %v1431_v61 }
  0x97   : > { %700 = vrot.lane.b32.xlu0 %v1092_v35, %s1216_s8  ;;  %724 = vrot.lane.b32.xlu1 %v667_v49, %s1218_s9  ;;  %v784_v55 = vsel %vm782_vm4, %v769_v41, %v1406_v38 }
  0x99   : > { %v1435_v4 = vpop.permute.xlu0 %515  ;;  %v1437_v5 = vpop.permute.xlu1 %534 }
  0x9a   : > { %v816_v37 = vsel %vm812_vm6, %v801_v47, %v1437_v5  ;;  %v799_v56 = vsel %vm797_vm5, %v784_v55, %v1435_v4 }
  0x9b   : > { %480 = vrot.lane.b32.xlu0 %v467_v32, %s1210_s24  ;;  %503 = vrot.lane.b32.xlu1 %v1083_v62, %s1208_s22  ;;  %v714_v32 = vrot.slane %v712_v28, 1 }
  0x9d   : > { %v533_v16 = vpop.permute.xlu0 %532  ;;  %v559_v17 = vpop.permute.xlu1 %558  ;;  %v715_v35 = vor.u32 %v714_v32, %v710_v31 }
  0x9e   : > { %v831_v57 = vsel %vm827_vm7, %v816_v37, %v559_v17  ;;  %v814_v48 = vsel %vm812_vm6, %v799_v56, %v533_v16 }
  0x9f   : > { %726 = vrot.lane.b32.xlu0 %v674_v7, %s1218_s9  ;;  %544 = vrot.lane.b32.xlu1 %v1085_v10, %s1212_s30 }
  0xa1   : > { %v557_v23 = vpop.permute.xlu0 %556  ;;  %v594_v24 = vpop.permute.xlu1 %593 }
  0xa2   : > { %v846_v58 = vsel %vm842_vm8, %v831_v57, %v594_v24  ;;  %v829_v61 = vsel %vm827_vm7, %v814_v48, %v557_v23 }
  0xa3   : > { %527 = vrot.lane.b32.xlu0 %v514_v18, %s1211_s26  ;;  %603 = vrot.lane.b32.xlu1 %v1093_v50, %s1214_s6 }
  0xa5   : > { %v592_v29 = vpop.permute.xlu0 %591  ;;  %v1447_v30 = vpop.permute.xlu1 %355 }
  0xa6   : > { %v844_v62 = vsel %vm842_vm8, %v829_v61, %v592_v29  ;;  %v742_v32 = vsel %vm730_vm1, %v1296_v43, %v1447_v30 }
  0xa7   : > { %568 = vrot.lane.b32.xlu0 %v555_v25, %s1213_s5  ;;  %704 = vrot.lane.b32.xlu1 %v1101_v26, %s1216_s8 }
  0xa9   : > { %v1452_v33 = vpop.permute.xlu0 %353  ;;  %v678_v34 = vpop.permute.xlu1 %677 }
  0xaa   : > { %v861_v38 = vsel %vm857_vm9, %v846_v58, %v678_v34 }
  0xab   : > { %687 = vrot.lane.b32.xlu0 %v674_v7, %s1215_s7  ;;  %915 = vperm.xlu1 %1150, %v912_v44  }
  0xad   : > { %v676_v40 = vpop.permute.xlu0 %675  ;;  %v1457_v42 = vpop.permute.xlu1 %390 }
  0xae   : > { %v859_v0 = vsel %vm857_vm9, %v844_v62, %v676_v40  ;;  %v760_v34 = vsel %vm752_vm2, %v742_v32, %v1457_v42 }
  0xaf   : > { %728 = vrot.lane.b32.xlu0 %v715_v35, %s1218_s9  ;;  %v739_v35 = vsel %vm730_vm1, %v1281_v15, %v1452_v33 }
  0xb1   : > { %v389_v49 = vpop.permute.xlu0 %388  ;;  %v695_v50 = vpop.permute.xlu1 %694 }
  0xb2   : > { %v876_v63 = vsel %vm872_vm10, %v861_v38, %v695_v50  ;;  %v758_v40 = vsel %vm752_vm2, %v739_v35, %v389_v49 }
  0xb5   : > { %v693_v54 = vpop.permute.xlu0 %692  ;;  %v475_v11 = vpop.permute.xlu1 %474 }
  0xb6   : > { %v874_v3 = vsel %vm872_vm10, %v859_v0, %v693_v54  ;;  %v775_v36 = vsel %vm767_vm3, %v760_v34, %v475_v11 }
  0xb9   : > { %v473_v59 = vpop.permute.xlu0 %472  ;;  %v719_v60 = vpop.permute.xlu1 %718 }
  0xba   : > { %v891_v1 = vsel %vm887_vm11, %v876_v63, %v719_v60  ;;  %v773_v2 = vsel %vm767_vm3, %v758_v40, %v473_v59 }
  0xbb   : > { %v905_v9 = vsel %vm902_vm12, %v891_v1, 0 }
  0xbd   : > { %v717_v4 = vpop.permute.xlu0 %716  ;;  %v498_v5 = vpop.permute.xlu1 %497 }
  0xbe   : > { %v889_v6 = vsel %vm887_vm11, %v874_v3, %v717_v4  ;;  %v790_v44 = vsel %vm782_vm4, %v775_v36, %v498_v5 }
  0xbf   : > { %v904_v7 = vsel %vm902_vm12, %v889_v6, 0 }
  0xc0   : > { %v1103_v10 = vcombine.low %v904_v7, %v905_v9 }
  0xc1   : > { %v496_v12 = vpop.permute.xlu0 %495  ;;  %v522_v13 = vpop.permute.xlu1 %521 }
  0xc2   : > { %1117 = vmatpush3.bf16.xpose.msra.mxu0 %v1103_v10  ;;  %v805_v50 = vsel %vm797_vm5, %v790_v44, %v522_v13  ;;  %v788_v43 = vsel %vm782_vm4, %v773_v2, %v496_v12 }
  0xc3   : > { %1118 = vmatprep.subr.bf16.mxu0 %v1217_v27 }
  0xc5   : > { %v520_v14 = vpop.permute.xlu0 %519  ;;  %v539_v16 = vpop.permute.xlu1 %538 }
  0xc6   : > { %v820_v30 = vsel %vm812_vm6, %v805_v50, %v539_v16  ;;  %v803_v42 = vsel %vm797_vm5, %v788_v43, %v520_v14 }
  0xc9   : > { %v537_v17 = vpop.permute.xlu0 %536  ;;  %v563_v18 = vpop.permute.xlu1 %562 }
  0xca   : > { %v835_v15 = vsel %vm827_vm7, %v820_v30, %v563_v18  ;;  %v818_v33 = vsel %vm812_vm6, %v803_v42, %v537_v17 }
  0xcd   : > { %v561_v19 = vpop.permute.xlu0 %560  ;;  %v598_v20 = vpop.permute.xlu1 %597 }
  0xce   : > { %v850_v49 = vsel %vm842_vm8, %v835_v15, %v598_v20  ;;  %v833_v41 = vsel %vm827_vm7, %v818_v33, %v561_v19 }
  0xd1   : > { %v596_v22 = vpop.permute.xlu0 %595  ;;  %v360_v23 = vpop.permute.xlu1 %359 }
  0xd2   : > { %v848_v54 = vsel %vm842_vm8, %v833_v41, %v596_v22  ;;  %v748_v18 = vsel %vm730_vm1, %v1351_v39, %v360_v23 }
  0xd5   : > { %v358_v24 = vpop.permute.xlu0 %357  ;;  %v682_v25 = vpop.permute.xlu1 %681 }
  0xd6   : > { %v865_v53 = vsel %vm857_vm9, %v850_v49, %v682_v25  ;;  %v745_v10 = vsel %vm730_vm1, %v1331_v21, %v358_v24 }
  0xd9   : > { %v680_v26 = vpop.permute.xlu0 %679  ;;  %v395_v28 = vpop.permute.xlu1 %394 }
  0xda   : > { %v863_v47 = vsel %vm857_vm9, %v848_v54, %v680_v26  ;;  %v764_v20 = vsel %vm752_vm2, %v748_v18, %v395_v28 }
  0xdd   : > { %v393_v29 = vpop.permute.xlu0 %392  ;;  %v699_v31 = vpop.permute.xlu1 %698 }
  0xde   : > { %v880_v11 = vsel %vm872_vm10, %v865_v53, %v699_v31  ;;  %v762_v12 = vsel %vm752_vm2, %v745_v10, %v393_v29 }
  0xe1   : > { %v697_v45 = vpop.permute.xlu0 %696  ;;  %v479_v46 = vpop.permute.xlu1 %478 }
  0xe2   : > { %v878_v37 = vsel %vm872_vm10, %v863_v47, %v697_v45  ;;  %v779_v25 = vsel %vm767_vm3, %v764_v20, %v479_v46 }
  0xe5   : > { %v477_v51 = vpop.permute.xlu0 %476  ;;  %v723_v52 = vpop.permute.xlu1 %722 }
  0xe6   : > { %v895_v55 = vsel %vm887_vm11, %v880_v11, %v723_v52  ;;  %v777_v13 = vsel %vm767_vm3, %v762_v12, %v477_v51 }
  0xe7   : > { %v907_v58 = vsel %vm902_vm12, %v895_v55, 0 }
  0xe9   : > { %v721_v56 = vpop.permute.xlu0 %720  ;;  %v502_v57 = vpop.permute.xlu1 %501 }
  0xea   : > { %v893_v48 = vsel %vm887_vm11, %v878_v37, %v721_v56  ;;  %v794_v24 = vsel %vm782_vm4, %v779_v25, %v502_v57 }
  0xeb   : > { %v906_v59 = vsel %vm902_vm12, %v893_v48, 0 }
  0xec   : > { %v1104_v60 = vcombine.low %v906_v59, %v907_v58 }
  0xed   : > { %v500_v61 = vpop.permute.xlu0 %499  ;;  %v526_v38 = vpop.permute.xlu1 %525 }
  0xee   : > { %1119 = vmatpush3.bf16.xpose.msra.mxu0 %v1104_v60  ;;  %v792_v14 = vsel %vm782_vm4, %v777_v13, %v500_v61  ;;  %v809_v32 = vsel %vm797_vm5, %v794_v24, %v526_v38  ;;  %v911_v61 = vld [vmem:[%s1581_s2] sm:$0xf] }
  0xef   : > { %1120 = vmatprep.subr.bf16.mxu0 %v1217_v27 }
  0xf1   : > { %v524_v62 = vpop.permute.xlu0 %523  ;;  %v543_v63 = vpop.permute.xlu1 %542 }
  0xf2   : > { %v807_v19 = vsel %vm797_vm5, %v792_v14, %v524_v62  ;;  %v824_v39 = vsel %vm812_vm6, %v809_v32, %v543_v63 }
  0xf5   : > { %v541_v0 = vpop.permute.xlu0 %540  ;;  %v567_v1 = vpop.permute.xlu1 %566 }
  0xf6   : > { %v822_v22 = vsel %vm812_vm6, %v807_v19, %v541_v0  ;;  %v839_v23 = vsel %vm827_vm7, %v824_v39, %v567_v1 }
  0xf9   : > { %v565_v3 = vpop.permute.xlu0 %564  ;;  %v602_v4 = vpop.permute.xlu1 %601 }
  0xfa   : > { %v837_v21 = vsel %vm827_vm7, %v822_v22, %v565_v3  ;;  %v854_v34 = vsel %vm842_vm8, %v839_v23, %v602_v4 }
  0xfd   : > { %v600_v5 = vpop.permute.xlu0 %599  ;;  %v684_v6 = vpop.permute.xlu1 %683 }
  0xfe   : > { %v852_v26 = vsel %vm842_vm8, %v837_v21, %v600_v5 }
  0xff   : > { %v867_v28 = vsel %vm857_vm9, %v852_v26, %v684_v6 }
 0x101   : > { %v362_v7 = vpop.permute.xlu0 %361  ;;  %v397_v9 = vpop.permute.xlu1 %396 }
 0x102   : > { %v751_v40 = vsel %vm730_vm1, %v1377_v8, %v362_v7 }
 0x103   : > { %v766_v2 = vsel %vm752_vm2, %v751_v40, %v397_v9 }
 0x105   : > { %v686_v16 = vpop.permute.xlu0 %685  ;;  %v703_v17 = vpop.permute.xlu1 %702 }
 0x106   : > { %v869_v44 = vsel %vm857_vm9, %v854_v34, %v686_v16 }
 0x107   : > { %v884_v50 = vsel %vm872_vm10, %v869_v44, %v703_v17 }
 0x109   : > { %v701_v29 = vpop.permute.xlu0 %700  ;;  %v725_v31 = vpop.permute.xlu1 %724 }
 0x10a   : > { %v882_v35 = vsel %vm872_vm10, %v867_v28, %v701_v29 }
 0x10b   : > { %v897_v46 = vsel %vm887_vm11, %v882_v35, %v725_v31 }
 0x10c   : > { %v908_v33 = vsel %vm902_vm12, %v897_v46, 0 }
 0x10d   : > { %v481_v36 = vpop.permute.xlu0 %480  ;;  %v504_v45 = vpop.permute.xlu1 %503 }
 0x10e   : > { %v781_v30 = vsel %vm767_vm3, %v766_v2, %v481_v36 }
 0x10f   : > { %v796_v51 = vsel %vm782_vm4, %v781_v30, %v504_v45 }
 0x111   : > { %v727_v43 = vpop.permute.xlu0 %726  ;;  %v545_v15 = vpop.permute.xlu1 %544 }
 0x112   : > { %v899_v42 = vsel %vm887_vm11, %v884_v50, %v727_v43 }
 0x113   : > { %v909_v49 = vsel %vm902_vm12, %v899_v42, 0 }
 0x114   : > { %v1105_v8 = vcombine.low %v908_v33, %v909_v49 }
 0x115   : > { %v528_v52 = vpop.permute.xlu0 %527  ;;  %v604_v53 = vpop.permute.xlu1 %603 }
 0x116   : > { %v811_v41 = vsel %vm797_vm5, %v796_v51, %v528_v52  ;;  %1121 = vmatpush3.bf16.xpose.msra.mxu0 %v1105_v8 }
 0x117   : > { %1122 = vmatprep.subr.bf16.mxu0 %v1217_v27  ;;  %v826_v54 = vsel %vm812_vm6, %v811_v41, %v545_v15 }
 0x119   : > { %v569_v11 = vpop.permute.xlu0 %568  ;;  %v705_v57 = vpop.permute.xlu1 %704 }
 0x11a   : > { %v841_v47 = vsel %vm827_vm7, %v826_v54, %v569_v11 }
 0x11b   : > { %v856_v55 = vsel %vm842_vm8, %v841_v47, %v604_v53 }
 0x11d   : > { %v688_v37 = vpop.permute.xlu0 %687 }
 0x11e   : > { %v871_v56 = vsel %vm857_vm9, %v856_v55, %v688_v37 }
 0x11f   : > { %v886_v48 = vsel %vm872_vm10, %v871_v56, %v705_v57 }
 0x121   : > { %v729_v58 = vpop.permute.xlu0 %728 }
 0x122   : > { %v901_v59 = vsel %vm887_vm11, %v886_v48, %v729_v58 }
 0x123   : > { %v910_v27 = vsel %vm902_vm12, %v901_v59, 0 }
 0x124   : > { %v1106_v60 = vcombine.low %v910_v27, %v910_v27 }
 0x126   : > { %1123 = vmatpush3.bf16.xpose.msra.mxu0 %v1106_v60 }
 0x12a   : > { %v916_v38 = vpop.permute.xlu1 %915 }
 0x12d   : > { %1125 = vmatmul.mubr.bf16.vlgmr.msra.gmra.mrb[0].mxu0 %v911_v61 }
 0x200   : > { %v974_v62 = vpop.f32.mrb[0].mxu0 }
 0x201   : > { %v975_v63 = vadd.f32 %v974_v62, %v916_v38  ;;  %v1126_v0 = vpop.f32.mrb[1].mxu0 }
 0x202   : > { %v977_v1 = vpop.f32.mrb[2].mxu0 }
 0x203   : > { %980 = vst.msk [vmem:[%s215_s19] sm:$0xff] %vm827_vm7, %v975_v63  ;;  %v1127_v3 = vpop.f32.mrb[3].mxu0 }
 0x204 PF: > { %s14_s15 = sadd.s32 1, %s1205_s15  }
 0x205   : > { %p11_p4 = scmp.ge.s32.totalorder %s14_s15, 4  }
 0x207   :  { %13 = sbr.rel (!%p11_p4) target bundleno = 1 (0x1), region = 69 }

</bundles_post_ra>
